<compile_context>
chip_gen: v6e
topology: v6e:2x2x1
jax: 0.10.0
libtpu: 0.0.40
codegen_flags: <defaults>
</compile_context>

<pallas_src>
import jax
import jax.numpy as jnp
from jax.experimental import pallas as pl
from jax.experimental.pallas import tpu as pltpu

IN_FEATURES = 768
OUT_FEATURES = 1024


def _round_up(x, m):
    return ((x + m - 1) // m) * m


def _addinfo_kernel(a_ref, b1_ref, b2_ref, w_ref, bias_ref, o_ref):
    # a/b1/b2: (tm, 768) f32; w: (768, tn) bf16; bias: (1, tn) f32.
    tm = a_ref.shape[0]
    w = w_ref[...]
    bias = bias_ref[...]

    if tm >= 128:
        # Three MXU dots against the same resident weight tile (no concat /
        # whole-block cast copies).  bf16 operands, f32 accumulation.
        za = jnp.dot(a_ref[...].astype(jnp.bfloat16), w,
                     preferred_element_type=jnp.float32)
        zb1 = jnp.dot(b1_ref[...].astype(jnp.bfloat16), w,
                      preferred_element_type=jnp.float32)
        zb2 = jnp.dot(b2_ref[...].astype(jnp.bfloat16), w,
                      preferred_element_type=jnp.float32)
        ya = jnp.tanh(za + bias)
        yb1 = jnp.tanh(zb1 + bias)
        yb2 = jnp.tanh(zb2 + bias)
    else:
        # Tiny batch tile: stack the three blocks along the sublane axis to
        # improve MXU row occupancy in a single pass.  Cast each ref to bf16
        # BEFORE the concat so the materialized copy is half-width.
        x = jnp.concatenate(
            [a_ref[...].astype(jnp.bfloat16),
             b1_ref[...].astype(jnp.bfloat16),
             b2_ref[...].astype(jnp.bfloat16)], axis=0)
        z = jnp.dot(x, w, preferred_element_type=jnp.float32)
        z = jnp.tanh(z + bias)
        ya = z[0 * tm:1 * tm, :]
        yb1 = z[1 * tm:2 * tm, :]
        yb2 = z[2 * tm:3 * tm, :]

    # out = A + (B1 - B2); dropout is identity in eval mode.
    # TODO(synk): train-mode dropout (p=0.5) would use pltpu.prng_seed +
    # pltpu.prng_random_bits to build the keep mask and scale by 2.0.
    o_ref[...] = (ya + (yb1 - yb2)).astype(o_ref.dtype)


def prepare_add_info_params(w, bias):
    """One-time 'model init': pre-cast weight to bf16, bias to (1, N) f32.

    Hoisting this out of the per-call path avoids a standalone XLA cast op
    (~4.5 MiB of extra HBM traffic) on every forward call.
    """
    assert w.shape == (IN_FEATURES, OUT_FEATURES)
    assert bias.shape == (OUT_FEATURES,)
    return w.astype(jnp.bfloat16), bias.reshape(1, OUT_FEATURES).astype(jnp.float32)


def add_info(a, b1, b2, w_bf16, bias2d, *, tm=256):
    """a, b1, b2: (M, 768) f32; w_bf16: (768, 1024) bf16; bias2d: (1, 1024) f32.

    Returns (M, 1024) in a.dtype.
    """
    m, k = a.shape
    n = w_bf16.shape[1]
    assert k == IN_FEATURES and n == OUT_FEATURES
    assert b1.shape == a.shape and b2.shape == a.shape

    # Pick the M tile: never above 256 (v7x VMEM headroom), at least the
    # 8-row sublane granule; pad ragged batches up to a tile multiple.
    tm = min(tm, 256)
    tm = min(tm, _round_up(m, 8))
    m_pad = _round_up(m, tm)
    if m_pad != m:
        pad = ((0, m_pad - m), (0, 0))
        a = jnp.pad(a, pad)
        b1 = jnp.pad(b1, pad)
        b2 = jnp.pad(b2, pad)

    m_tiles = m_pad // tm
    # Full-N tile when there are multiple M steps -> weight block index is
    # grid-constant, DMA'd once and kept resident.  For a single M step,
    # split N 2-way (marked parallel) so v7x megacore shares the work; each
    # weight half is still fetched exactly once.
    n_tiles = 2 if m_tiles == 1 else 1
    tn = n // n_tiles

    x_spec = pl.BlockSpec((tm, k), lambda i, j: (i, 0))   # constant along N
    w_spec = pl.BlockSpec((k, tn), lambda i, j: (0, j))   # constant along M
    b_spec = pl.BlockSpec((1, tn), lambda i, j: (0, j))
    o_spec = pl.BlockSpec((tm, tn), lambda i, j: (i, j))

    out = pl.pallas_call(
        _addinfo_kernel,
        out_shape=jax.ShapeDtypeStruct((m_pad, n), a.dtype),
        grid_spec=pltpu.PrefetchScalarGridSpec(
            num_scalar_prefetch=0,
            grid=(m_tiles, n_tiles),
            in_specs=[x_spec, x_spec, x_spec, w_spec, b_spec],
            out_specs=o_spec,
        ),
        compiler_params=pltpu.CompilerParams(
            dimension_semantics=("parallel", "parallel"),
            vmem_limit_bytes=32 * 1024 * 1024,
        ),
    )(a, b1, b2, w_bf16, bias2d)

    if m_pad != m:
        out = out[:m]
    return out


def add_info_ref_f32(a, b1, b2, w, bias):
    # Full-f32 reference of the original module's forward (eval mode).
    ya = jnp.tanh(a @ w + bias)
    yb1 = jnp.tanh(b1 @ w + bias)
    yb2 = jnp.tanh(b2 @ w + bias)
    return ya + (yb1 - yb2)


def add_info_ref_bf16(a, b1, b2, w, bias):
    # bf16-operand / f32-accumulation reference (matches the kernel's matmul
    # precision) for a tight correctness check.
    wb = w.astype(jnp.bfloat16)

    def lin(x):
        z = jnp.dot(x.astype(jnp.bfloat16), wb,
                    preferred_element_type=jnp.float32)
        return jnp.tanh(z + bias)

    return lin(a) + (lin(b1) - lin(b2))


if __name__ == "__main__":
    key = jax.random.PRNGKey(0)
    k_a, k_b1, k_b2, k_w, k_b = jax.random.split(key, 5)

    batch = 8  # small batch; feature dims (768 -> 1024) are fixed by the module
    a = jax.random.normal(k_a, (batch, IN_FEATURES), dtype=jnp.float32)
    b1 = jax.random.normal(k_b1, (batch, IN_FEATURES), dtype=jnp.float32)
    b2 = jax.random.normal(k_b2, (batch, IN_FEATURES), dtype=jnp.float32)

    # Deterministic parameter init (uniform like PyTorch's Linear default).
    bound = 1.0 / (IN_FEATURES ** 0.5)
    w = jax.random.uniform(
        k_w, (IN_FEATURES, OUT_FEATURES), jnp.float32, -bound, bound)
    bias = jax.random.uniform(
        k_b, (OUT_FEATURES,), jnp.float32, -bound, bound)

    # One-time param prep (hoisted out of the per-call path).
    w_bf16, bias2d = prepare_add_info_params(w, bias)

    out = add_info(a, b1, b2, w_bf16, bias2d)
    out = jax.block_until_ready(out)
    assert out.shape == (batch, OUT_FEATURES)

    # Tight check vs a bf16-matmul/f32-accum reference.
    ref_bf16 = add_info_ref_bf16(a, b1, b2, w, bias)
    assert jnp.allclose(out, ref_bf16, atol=2e-3, rtol=2e-3), \
        "mismatch vs bf16-emulated reference"

    # Looser sanity check vs the pure-f32 reference of the original module.
    ref_f32 = add_info_ref_f32(a, b1, b2, w, bias)
    assert jnp.allclose(out, ref_f32, atol=3e-2, rtol=3e-2), \
        "mismatch vs f32 reference"

    print("KERNEL_OK")
</pallas_src>

<mosaic_0001>
module attributes {stable_mosaic.version = 11 : i64} {
  func.func @_addinfo_kernel(%arg0: i32, %arg1: i32, %arg2: memref<8x768xf32, #tpu.memory_space<vmem>>, %arg3: memref<8x768xf32, #tpu.memory_space<vmem>>, %arg4: memref<8x768xf32, #tpu.memory_space<vmem>>, %arg5: memref<768x512xbf16, #tpu.memory_space<vmem>>, %arg6: memref<1x512xf32, #tpu.memory_space<vmem>>, %arg7: memref<8x512xf32, #tpu.memory_space<vmem>>) attributes {dimension_semantics = [#tpu.dimension_semantics<parallel>, #tpu.dimension_semantics<parallel>], iteration_bounds = array<i64: 1, 2>, scalar_prefetch = 0 : i64, scratch_operands = 0 : i64, tpu.core_type = #tpu.core_type<tc>, window_params = [{transform_indices = @transform_0, window_bounds = array<i64: 8, 768>}, {transform_indices = @transform_1, window_bounds = array<i64: 8, 768>}, {transform_indices = @transform_2, window_bounds = array<i64: 8, 768>}, {transform_indices = @transform_3, window_bounds = array<i64: 768, 512>}, {transform_indices = @transform_4, window_bounds = array<i64: 1, 512>}, {transform_indices = @transform_5, window_bounds = array<i64: 8, 512>}]} {
    %c0 = arith.constant 0 : index
    %c0_0 = arith.constant 0 : index
    %0 = vector.load %arg5[%c0, %c0_0] : memref<768x512xbf16, #tpu.memory_space<vmem>>, vector<768x512xbf16>
    %c0_1 = arith.constant 0 : index
    %c0_2 = arith.constant 0 : index
    %1 = vector.load %arg6[%c0_1, %c0_2] : memref<1x512xf32, #tpu.memory_space<vmem>>, vector<1x512xf32>
    %c0_3 = arith.constant 0 : index
    %c0_4 = arith.constant 0 : index
    %2 = vector.load %arg2[%c0_3, %c0_4] : memref<8x768xf32, #tpu.memory_space<vmem>>, vector<8x768xf32>
    %3 = arith.truncf %2 : vector<8x768xf32> to vector<8x768xbf16>
    %c0_5 = arith.constant 0 : index
    %c0_6 = arith.constant 0 : index
    %4 = vector.load %arg3[%c0_5, %c0_6] : memref<8x768xf32, #tpu.memory_space<vmem>>, vector<8x768xf32>
    %5 = arith.truncf %4 : vector<8x768xf32> to vector<8x768xbf16>
    %c0_7 = arith.constant 0 : index
    %c0_8 = arith.constant 0 : index
    %6 = vector.load %arg4[%c0_7, %c0_8] : memref<8x768xf32, #tpu.memory_space<vmem>>, vector<8x768xf32>
    %7 = arith.truncf %6 : vector<8x768xf32> to vector<8x768xbf16>
    %8 = tpu.concatenate %3, %5, %7 in 0 : vector<8x768xbf16>, vector<8x768xbf16>, vector<8x768xbf16> -> vector<24x768xbf16>
    %cst = arith.constant dense<0.000000e+00> : vector<24x512xf32>
    %9 = tpu.matmul %8, %0, %cst {dimension_numbers = #tpu.dot_dimension_numbers<[1], [0], [0], [1], [0, 0, 1, 1], [], []>} : vector<24x768xbf16>, vector<768x512xbf16>, vector<24x512xf32> -> vector<24x512xf32>
    %10 = vector.broadcast %1 : vector<1x512xf32> to vector<24x512xf32>
    %11 = arith.addf %9, %10 : vector<24x512xf32>
    %12 = math.tanh %11 : vector<24x512xf32>
    %13 = vector.extract_strided_slice %12 {offsets = [0, 0], sizes = [8, 512], strides = [1, 1]} : vector<24x512xf32> to vector<8x512xf32>
    %14 = vector.extract_strided_slice %12 {offsets = [8, 0], sizes = [8, 512], strides = [1, 1]} : vector<24x512xf32> to vector<8x512xf32>
    %15 = vector.extract_strided_slice %12 {offsets = [16, 0], sizes = [8, 512], strides = [1, 1]} : vector<24x512xf32> to vector<8x512xf32>
    %16 = arith.subf %14, %15 : vector<8x512xf32>
    %17 = arith.addf %13, %16 : vector<8x512xf32>
    %c0_9 = arith.constant 0 : index
    %c0_10 = arith.constant 0 : index
    %18 = vector.load %arg7[%c0_9, %c0_10] : memref<8x512xf32, #tpu.memory_space<vmem>>, vector<8x512xf32>
    tpu.vector_store %arg7[%c0_9, %c0_10], %17 {strides = array<i32>} : memref<8x512xf32, #tpu.memory_space<vmem>>, vector<8x512xf32>,
    return
  }
  func.func @transform_0(%arg0: i32, %arg1: i32) -> (i32, i32) {
    %c0_i32 = arith.constant 0 : i32
    %c0_i32_0 = arith.constant 0 : i32
    return %arg0, %c0_i32 : i32, i32
  }
  func.func @transform_1(%arg0: i32, %arg1: i32) -> (i32, i32) {
    %c0_i32 = arith.constant 0 : i32
    %c0_i32_0 = arith.constant 0 : i32
    return %arg0, %c0_i32 : i32, i32
  }
  func.func @transform_2(%arg0: i32, %arg1: i32) -> (i32, i32) {
    %c0_i32 = arith.constant 0 : i32
    %c0_i32_0 = arith.constant 0 : i32
    return %arg0, %c0_i32 : i32, i32
  }
  func.func @transform_3(%arg0: i32, %arg1: i32) -> (i32, i32) {
    %c0_i32 = arith.constant 0 : i32
    %c0_i32_0 = arith.constant 0 : i32
    return %c0_i32, %arg1 : i32, i32
  }
  func.func @transform_4(%arg0: i32, %arg1: i32) -> (i32, i32) {
    %c0_i32 = arith.constant 0 : i32
    %c0_i32_0 = arith.constant 0 : i32
    return %c0_i32, %arg1 : i32, i32
  }
  func.func @transform_5(%arg0: i32, %arg1: i32) -> (i32, i32) {
    %c0_i32 = arith.constant 0 : i32
    return %arg0, %arg1 : i32, i32
  }
}

</mosaic_0001>

<bundles_post_ra>
// kernel: tpu_custom_call.1
= control target key start
LH: loop header
LB: loop body
LE: loop exit
PB: predicated region body
PF: predicated region fallthrough
CT: control target
= control target key end

     0   :  { %s3462_s0 = inlined_call_operand.hbm [shape: f32[8,768], index: 0, kind: input, shape index: {}]   ;;  %s3463_s1 = inlined_call_operand.hbm [shape: f32[8,768], index: 1, kind: input, shape index: {}]   ;;  %s3464_s2 = inlined_call_operand.hbm [shape: f32[8,768], index: 2, kind: input, shape index: {}]   ;;  %s3465_s3 = inlined_call_operand.hbm [shape: bf16[768,1024], index: 3, kind: input, shape index: {}]   ;;  %s3466_s4 = inlined_call_operand.hbm [shape: f32[1,1024], index: 4, kind: input, shape index: {}]   ;;  %s3467_s5 = inlined_call_operand.hbm [shape: f32[8,1024], index: 5, kind: output, shape index: {}]  }
   0x1   :  { %3474 = sst [smem:[#allocation18_spill]] %s3463_s1 }
   0x2   :  { %3475 = sst [smem:[#allocation19_spill]] %s3465_s3 }
   0x3   :  { %10 = vsyncpa [#allocation3], 0 }
   0x4   :  { %11 = vsyncpa [#allocation6], 0 }
   0x5   :  { %12 = vsyncpa [#allocation9], 0 }
   0x6   :  { %14 = vsyncpa [#allocation9 + $0x1], 0 }
   0x7   :  { %15 = vsyncpa [#allocation4], 0 }
   0x8   :  { %17 = vsyncpa [#allocation4 + $0x1], 0  ;;  %s2985_s18 = smov 0   ;;  %s2987_s19 = smov 0  }
   0x9   :  { %s2989_s20 = smov 0   ;;  %s2991_s21 = smov 0  }
   0xa   :  { %s2993_s22 = smov 0   ;;  %s2995_s23 = smov 0  }
   0xb LB: > { %3476 = sst [smem:[#allocation16_spill]] %s2944_s23  ;;  %s3016_s24 = sadd.s32 4294967295, %s2944_s23   ;;  %s2944_s23 = sphi %s2995_s23, %s23_s23   ;;  %s2940_s22 = sphi %s2993_s22, %s3501_s22   ;;  %s2936_s21 = sphi %s2991_s21, %s3500_s21   ;;  %s2932_s20 = sphi %s2989_s20, %s3499_s20   ;;  %s2928_s19 = sphi %s2987_s19, %s3498_s19   ;;  %s2924_s18 = sphi %s2985_s18, %s3497_s18  }
   0xc   : > { %s2090_s25 = sadd.s32 4294967294, %s2944_s23   ;;  %s120_s26 = sadd.s32 1, %s2932_s20 }
   0xd   : > { %p127_p0 = scmp.ne.s32.totalorder %s2932_s20, %s2928_s19  ;;  %p128_p1 = scmp.eq.s32.totalorder %s2944_s23, 0 }
   0xe   : > { %p133_p2 = scmp.ne.s32.totalorder %s2928_s19, %s2924_s18  ;;  %p3473_p3 = scmp.eq.s32.totalorder %s3016_s24, 0 }
   0xf   : > { %p185_p4 = scmp.eq.s32.totalorder %s3016_s24, 1  ;;  %p3027_p5 = por %p128_p1, %p127_p0 }
  0x10   : > { %p191_p6 = scmp.eq.s32.totalorder %s2090_s25, 1  ;;  %p3033_p7 = por %p3473_p3, %p133_p2 }
  0x11   : > { %p3037_p8 = por %p185_p4, %p127_p0  ;;  %p2091_p10 = scmp.ge.s32.totalorder %s2944_s23, 1 }
  0x12   : > { %p3041_p9 = por %p191_p6, %p133_p2  ;;  %p198_p11 = scmp.lt.s32.totalorder %s2944_s23, 3 }
  0x13   : > { %s3479_s29 = scalar_select %p3037_p8, 1, 0 }
  0x14   : > { %s3480_s30 = scalar_select %p3041_p9, 1, 0 }
  0x15   : > { %p3048_p13 = pnand %p2091_p10, %p198_p11  ;;  %s2946_s7 = smov [#allocation5]  }
  0x16   : > { %3481 = sst [smem:[#allocation17_spill]] %s3480_s30  ;;  %s228_s8 = sshll.u32 %s2946_s7, 4  ;;  %s229_s8 = int_to_ptr.vmem [resolvable:$true] %s228_s8 }
  0x17   : > { %p2351_p1 = scmp.lt.s32.totalorder %s2944_s23, 2  ;;  %p2327_p0 = pneg %p3048_p13 }
  0x18   : > { %s32_s11 = sadd.s32 1, %s2940_s22  ;;  %s253_s12 = sand.u32 1, %s2944_s23  }
  0x19   : > { %p3057_p4 = pnand %p2351_p1, %p3027_p5  ;;  %p3063_p2 = pnand %p2327_p0, %p3473_p3 }
  0x1a   : > { %p33_p6 = scmp.ge.s32.totalorder %s32_s11, 2  ;;  %s2733_s13 = scalar_lea.vmem %s229_s8, 768 }
  0x1b   : > { %p2724_p10 = pneg %p3063_p2  ;;  %p2734_p11 = scmp.ne.s32.totalorder %s229_s8, %s2733_s13 }
  0x1c   : > { %p2741_p12 = scmp.lt.s32.totalorder %s229_s8, %s229_s8  ;;  %p2742_p9 = scmp.lt.s32.totalorder %s2733_s13, %s2733_s13 }
  0x1d   : > { %p2736_p5 = pnand %p2734_p11, %p2724_p10 }
  0x1e   : > { %p2743_p8 = por %p2742_p9, %p2741_p12 }
  0x1f   : > { %p2737_p1 = pneg %p2736_p5 }
  0x21   : > { %p2744_p0 = pnand %p2743_p8, %p2737_p1 }
  0x23   : > { %2747 = shalt.err (!%p2744_p0)
}
  0x24   : > { %s3485_s1 = sld [smem:[#allocation18_spill]]  ;;  %s3503_s11 = smov (%p33_p6, %s32_s11), 0 }
  0x25   : > { %s3472_s16 = sand.u32 1, %s2932_s20   ;;  %s117_s17 = ssub.s32 %s2940_s22, %s3503_s11 }
  0x26   : > { %s2307_s25 = smul.u32 1536, %s3472_s16  ;;  %p118_p8 = scmp.eq.s32.totalorder %s117_s17, 0 }
  0x27   : > { %s2304_s27 = sshll.u32 %s2940_s22, 8  ;;  %s3486_s3 = sld [smem:[#allocation19_spill]] }
  0x28   : > { %s3093_s15 = scalar_select %p118_p8, %s2932_s20, %s120_s26  }
  0x29   : > { %s257_s23 = scalar_lea.vmem [#allocation8], %s2307_s25  ;;  %p2750_p9 = pneg %p3057_p4 }
  0x2a   : > { %2333 = dma.hbm_to_vmem [thread:$0]  (!%p3063_p2), %s3485_s1, 768, %s229_s8, [#allocation6]  }
  0x2b   : > { %s264_s30 = sshll.u32 %s257_s23, 4  ;;  %s3095_s8 = scalar_lea.sflag [#allocation9], %s253_s12  ;;  %s265_s30 = int_to_ptr.vmem [resolvable:$true] %s264_s30 }
  0x2c   : > { %s2761_s1 = scalar_lea.vmem %s265_s30, 24576  ;;  %s2947_s17 = smov [#allocation8]  }
  0x2d   : > { %s263_s14 = scalar_lea.hbm %s3486_s3, %s2304_s27  ;;  %p2762_p12 = scmp.ne.s32.totalorder %s265_s30, %s2761_s1 }
  0x2e   : > { %s2766_s16 = sshll.u32 %s2947_s17, 4  ;;  %s2767_s16 = int_to_ptr.vmem [resolvable:$false] %s2766_s16 }
  0x2f   : > { %p2764_p6 = pnand %p2762_p12, %p2750_p9  ;;  %s2768_s27 = scalar_lea.vmem %s2767_s16, 49152 }
  0x30   : > { %p2769_p5 = scmp.lt.s32.totalorder %s265_s30, %s2767_s16  ;;  %p2770_p1 = scmp.lt.s32.totalorder %s2768_s27, %s2761_s1 }
  0x31   : > { %p2765_p11 = pneg %p2764_p6 }
  0x32   : > { %p2771_p0 = por %p2770_p1, %p2769_p5 }
  0x34   : > { %p2772_p8 = pnand %p2771_p0, %p2765_p11 }
  0x36   : > { %2775 = shalt.err (!%p2772_p8)
}
  0x37   : > { %s2948_s23 = smov 512   ;;  %s2949_s26 = smov 256  }
  0x38   : > { %s2950_s12 = smov 16   ;;  %s2951_s25 = smov [#allocation2]  }
  0x39   : > { %2340 = dma.hbm_to_vmem [thread:$0]  (!%p3057_p4), %s263_s14, 24576, %s265_s30, %s3095_s8, %s2948_s23, %s2949_s26, %s2950_s12  }
  0x3a   : > { %s214_s7 = sshll.u32 %s2951_s25, 4  ;;  %s2952_s13 = smov [#allocation7]   ;;  %s215_s7 = int_to_ptr.vmem [resolvable:$true] %s214_s7 }
  0x3b   : > { %s242_s17 = sshll.u32 %s2952_s13, 4  ;;  %s2787_s3 = scalar_lea.vmem %s215_s7, 768  ;;  %s243_s17 = int_to_ptr.vmem [resolvable:$true] %s242_s17 }
  0x3c   : > { %p2788_p12 = scmp.ne.s32.totalorder %s215_s7, %s2787_s3  ;;  %p2795_p5 = scmp.lt.s32.totalorder %s215_s7, %s215_s7 }
  0x3d   : > { %p2796_p1 = scmp.lt.s32.totalorder %s2787_s3, %s2787_s3 }
  0x3e   : > { %p2790_p6 = pnand %p2788_p12, %p2724_p10 }
  0x3f   : > { %p2797_p0 = por %p2796_p1, %p2795_p5 }
  0x40   : > { %p2791_p11 = pneg %p2790_p6 }
  0x42   : > { %p2798_p8 = pnand %p2797_p0, %p2791_p11 }
  0x44   : > { %2801 = shalt.err (!%p2798_p8)
}
  0x45   : > { %2330 = dma.hbm_to_vmem [thread:$0]  (!%p3063_p2), %s3462_s0, 768, %s215_s7, [#allocation3]  }
  0x46   : > { %s3487_s16 = sand.u32 1, %s2932_s20   ;;  %s2813_s27 = scalar_lea.vmem %s243_s17, 768 }
  0x47   : > { %s2098_s14 = sshll.u32 %s3487_s16, 2  ;;  %p2814_p3 = scmp.ne.s32.totalorder %s243_s17, %s2813_s27 }
  0x48   : > { %p2821_p5 = scmp.lt.s32.totalorder %s243_s17, %s243_s17  ;;  %p2822_p11 = scmp.lt.s32.totalorder %s2813_s27, %s2813_s27 }
  0x49   : > { %p2816_p12 = pnand %p2814_p3, %p2724_p10 }
  0x4a   : > { %p2823_p1 = por %p2822_p11, %p2821_p5 }
  0x4b   : > { %p2817_p6 = pneg %p2816_p12 }
  0x4d   : > { %p2824_p0 = pnand %p2823_p1, %p2817_p6 }
  0x4f   : > { %2827 = shalt.err (!%p2824_p0)
}
  0x50   : > { %2336 = dma.hbm_to_vmem [thread:$0]  (!%p3063_p2), %s3464_s2, 768, %s243_s17, [#allocation6]  }
  0x51   : > { %s2305_s26 = sshll.u32 %s2940_s22, 6  ;;  %s278_s13 = scalar_lea.vmem [#allocation10], %s2098_s14 }
  0x52   : > { %s284_s7 = scalar_lea.hbm %s3466_s4, %s2305_s26  ;;  %s286_s1 = sshll.u32 %s278_s13, 4  ;;  %s287_s1 = int_to_ptr.vmem [resolvable:$true] %s286_s1 }
  0x53   : > { %s2841_s30 = scalar_lea.vmem %s287_s1, 64  ;;  %s2953_s10 = smov [#allocation10]  }
  0x54   : > { %p2842_p3 = scmp.ne.s32.totalorder %s287_s1, %s2841_s30  ;;  %s2846_s16 = sshll.u32 %s2953_s10, 4  ;;  %s2847_s16 = int_to_ptr.vmem [resolvable:$false] %s2846_s16 }
  0x55   : > { %s2848_s27 = scalar_lea.vmem %s2847_s16, 128  ;;  %p2849_p12 = scmp.lt.s32.totalorder %s287_s1, %s2847_s16 }
  0x56   : > { %p2844_p10 = pnand %p2842_p3, %p2750_p9  ;;  %p2850_p2 = scmp.lt.s32.totalorder %s2848_s27, %s2841_s30 }
  0x58   : > { %p2845_p8 = pneg %p2844_p10  ;;  %p2851_p6 = por %p2850_p2, %p2849_p12 }
  0x5a   : > { %p2852_p5 = pnand %p2851_p6, %p2845_p8 }
  0x5c   : > { %2855 = shalt.err (!%p2852_p5)
}
  0x5d   : > { %2343 = dma.hbm_to_vmem [thread:$0]  (!%p3057_p4), %s284_s7, 64, %s287_s1, %s3095_s8  }
  0x5e   : > { %295 = sbr.rel (%p3048_p13) target bundleno = 540 (0x21c), region = 40  ;;  %p3488_p11 = scmp.eq.s32.totalorder (!%p3048_p13), %s3016_s24, 0 }
  0x63   : > { %2907 = dma.done.wait (%p3488_p11), [#allocation3], 768   ;;  %p3489_p9 = pmov %p3488_p11 }
  0x65   : > { %2909 = vsyncadd (%p3489_p9), [#allocation3], 4294966528  ;;  %p3490_p1 = pmov %p3489_p9 }
  0x67   : > { %2911 = dma.done.wait (%p3490_p1), [#allocation6], 1536   ;;  %p3491_p0 = pmov %p3490_p1 }
  0x68   : > { %s309_s9 = sand.u32 1, %s3016_s24   ;;  %s3145_s8 = sand.u32 1, %s2928_s19  }
  0x69   : > { %2913 = vsyncadd (%p3491_p0), [#allocation6], 4294965760  ;;  %s2308_s6 = smul.u32 1536, %s3145_s8  ;;  %s310_s17 = scalar_lea.sflag [#allocation9], %s309_s9 }
  0x6b   : > { %s3148_s14 = scalar_lea.vmem [#allocation8], %s2308_s6 }
  0x6c   : > { %2915 = dma.done.wait (%p3033_p7), %s310_s17, 24640  }
  0x6d   : > { %2917 = vsyncadd (%p3033_p7), %s310_s17, 4294942656  ;;  %v2410_v0 = vld [vmem:[%s3148_s14 + $0xe4] ss:$16 sps:$4 sm:$0xff]   ;;  %v2414_v2 = vld [vmem:[%s3148_s14 + $0xe0] ss:$16 sps:$4 sm:$0xff]   ;;  %vm598_vm0 = vcmask 1043456  }
  0x6e   : > { %v2412_v1 = vld [vmem:[%s3148_s14 + $0x2e4] ss:$16 sps:$4 sm:$0xff]   ;;  %1604 = vmatprep.subr.bf16.mxu0 %v2410_v0  ;;  %v2415_v3 = vld [vmem:[%s3148_s14 + $0x2e0] ss:$16 sps:$4 sm:$0xff]   ;;  %v551_v46 = vld [vmem:[#allocation2 + $0x8] sm:$0xff]  ;;  %s2105_s24 = sshll.u32 %s3145_s8, 2 }
  0x6f   : > { %1655 = vmatprep.subr.bf16.mxu1 %v2412_v1  ;;  %v2416_v4 = vld [vmem:[%s3148_s14 + $0xc4] ss:$16 sps:$4 sm:$0xff]   ;;  %1605 = vmatpush1.bf16.msra.mxu0 %v2414_v2  ;;  %v2420_v6 = vld [vmem:[%s3148_s14 + $0xc0] ss:$16 sps:$4 sm:$0xff]   ;;  %v557_v47 = vpack.c.bf16 %v551_v46, %v551_v46  ;;  %v563_v48 = vld [vmem:[#allocation5 + $0x8] sm:$0xff]  ;;  %s322_s28 = scalar_lea.vmem [#allocation10], %s2105_s24 }
  0x70   : > { %1656 = vmatpush1.bf16.msra.mxu1 %v2415_v3  ;;  %v2418_v5 = vld [vmem:[%s3148_s14 + $0x2c4] ss:$16 sps:$4 sm:$0xff]   ;;  %1606 = vmatprep.subr.bf16.mxu0 %v2416_v4  ;;  %v2421_v7 = vld [vmem:[%s3148_s14 + $0x2c0] ss:$16 sps:$4 sm:$0xff]   ;;  %v553_v49 = vld [vmem:[#allocation2 + $0x18] sm:$0xff]  ;;  %v569_v54 = vpack.c.bf16 %v563_v48, %v563_v48  ;;  %s2106_s3 = sshll.u32 %s3145_s8, 5 }
  0x71   : > { %1657 = vmatprep.subr.bf16.mxu1 %v2418_v5  ;;  %v2422_v8 = vld [vmem:[%s3148_s14 + $0xa4] ss:$16 sps:$4 sm:$0xff]   ;;  %v2426_v10 = vld [vmem:[%s3148_s14 + $0xa0] ss:$16 sps:$4 sm:$0xff]   ;;  %v565_v50 = vld [vmem:[#allocation5 + $0x18] sm:$0xff]  ;;  %v559_v55 = vpack.c.bf16 %v553_v49, %v553_v49  ;;  %s3412_s23 = scalar_lea.vmem [#allocation11], %s2106_s3 }
  0x72   : > { %v2424_v9 = vld [vmem:[%s3148_s14 + $0x2a4] ss:$16 sps:$4 sm:$0xff]   ;;  %v2427_v11 = vld [vmem:[%s3148_s14 + $0x2a0] ss:$16 sps:$4 sm:$0xff]   ;;  %v571_v56 = vpack.c.bf16 %v565_v50, %v565_v50  ;;  %v593_v58 = vrot.slane %v569_v54, 4  ;;  %v575_v46 = vld [vmem:[#allocation7 + $0x8] sm:$0xff] }
  0x73   : > { %1607 = vmatpush1.bf16.msra.mxu0 %v2420_v6  ;;  %v2428_v12 = vld [vmem:[%s3148_s14 + $0x84] ss:$16 sps:$4 sm:$0xff]   ;;  %v2432_v14 = vld [vmem:[%s3148_s14 + $0x80] ss:$16 sps:$4 sm:$0xff]   ;;  %v3256_v48 = vpack.c.bf16 %v575_v46, %v575_v46  ;;  %v577_v49 = vld [vmem:[#allocation7 + $0x18] sm:$0xff]  ;;  %s2306_s26 = sshll.u32 %s2936_s21, 9 }
  0x74   : > { %1658 = vmatpush1.bf16.msra.mxu1 %v2421_v7  ;;  %1608 = vmatprep.subr.bf16.mxu0 %v2422_v8  ;;  %v2430_v13 = vld [vmem:[%s3148_s14 + $0x284] ss:$16 sps:$4 sm:$0xff]   ;;  %v2433_v15 = vld [vmem:[%s3148_s14 + $0x280] ss:$16 sps:$4 sm:$0xff]   ;;  %v595_v59 = vrot.slane %v571_v56, 4  ;;  %v3207_v62 = vsel %vm598_vm0, %v557_v47, %v593_v58  ;;  %s1951_s12 = sshll.u32 %s3412_s23, 4  ;;  %s1949_s13 = scalar_lea.hbm %s3467_s5, %s2306_s26  ;;  %s1952_s12 = int_to_ptr.vmem [resolvable:$true] %s1951_s12 }
  0x75   : > { %1659 = vmatprep.subr.bf16.mxu1 %v2424_v9  ;;  %v2434_v16 = vld [vmem:[%s3148_s14 + $0x64] ss:$16 sps:$4 sm:$0xff]   ;;  %v2438_v18 = vld [vmem:[%s3148_s14 + $0x60] ss:$16 sps:$4 sm:$0xff]   ;;  %1636 = vmatprep.mubr.bf16.mxu0 %v3207_v62  ;;  %v2547_v56 = vld [vmem:[%s3148_s14 + $0x2c] ss:$16 sps:$4 sm:$0xff]  }
  0x76   : > { %v2436_v17 = vld [vmem:[%s3148_s14 + $0x264] ss:$16 sps:$4 sm:$0xff]   ;;  %v2439_v19 = vld [vmem:[%s3148_s14 + $0x260] ss:$16 sps:$4 sm:$0xff]   ;;  %v3210_v63 = vsel %vm598_vm0, %v559_v55, %v595_v59  ;;  %v2545_v59 = vld [vmem:[%s3148_s14 + $0x28] ss:$16 sps:$4 sm:$0xff]  }
  0x77   : > { %1609 = vmatpush1.bf16.msra.mxu0 %v2426_v10  ;;  %v2440_v20 = vld [vmem:[%s3148_s14 + $0x44] ss:$16 sps:$4 sm:$0xff]   ;;  %v2444_v22 = vld [vmem:[%s3148_s14 + $0x40] ss:$16 sps:$4 sm:$0xff]   ;;  %1687 = vmatprep.mubr.bf16.mxu1 %v3210_v63  ;;  %v2604_v46 = vld [vmem:[%s3148_s14 + $0x2ec] ss:$16 sps:$4 sm:$0xff]  }
  0x78   : > { %1660 = vmatpush1.bf16.msra.mxu1 %v2427_v11  ;;  %1610 = vmatprep.subr.bf16.mxu0 %v2428_v12  ;;  %v2442_v21 = vld [vmem:[%s3148_s14 + $0x244] ss:$16 sps:$4 sm:$0xff]   ;;  %v2445_v23 = vld [vmem:[%s3148_s14 + $0x240] ss:$16 sps:$4 sm:$0xff]   ;;  %s1935_s1 = scalar_lea.sflag [#allocation4], %s3145_s8  ;;  %s2856_s30 = scalar_lea.vmem %s1952_s12, 512 }
  0x79   : > { %1661 = vmatprep.subr.bf16.mxu1 %v2430_v13  ;;  %v2446_v24 = vld [vmem:[%s3148_s14 + $0x24] ss:$16 sps:$4 sm:$0xff]   ;;  %v2450_v26 = vld [vmem:[%s3148_s14 + $0x20] ss:$16 sps:$4 sm:$0xff]   ;;  %p2857_p7 = scmp.ne.s32.totalorder %s1952_s12, %s2856_s30  ;;  %p3492_p13 = scmp.ne.s32.totalorder %s3479_s29, 0 }
  0x7a   : > { %v2448_v25 = vld [vmem:[%s3148_s14 + $0x224] ss:$16 sps:$4 sm:$0xff]   ;;  %v2451_v27 = vld [vmem:[%s3148_s14 + $0x220] ss:$16 sps:$4 sm:$0xff]   ;;  %s2954_s10 = smov [#allocation11]  }
  0x7b   : > { %1611 = vmatpush1.bf16.msra.mxu0 %v2432_v14  ;;  %v2452_v28 = vld [vmem:[%s3148_s14 + $0x4] ss:$16 sps:$4 sm:$0xff]   ;;  %v2456_v30 = vld [vmem:[%s3148_s14] ss:$16 sps:$4 sm:$0xff]   ;;  %p2858_p4 = pnand %p2857_p7, %p3492_p13  ;;  %s2860_s21 = sshll.u32 %s2954_s10, 4  ;;  %s2861_s21 = int_to_ptr.vmem [resolvable:$false] %s2860_s21 }
  0x7c   : > { %1662 = vmatpush1.bf16.msra.mxu1 %v2433_v15  ;;  %1612 = vmatprep.subr.bf16.mxu0 %v2434_v16  ;;  %v2454_v29 = vld [vmem:[%s3148_s14 + $0x204] ss:$16 sps:$4 sm:$0xff]   ;;  %v2457_v31 = vld [vmem:[%s3148_s14 + $0x200] ss:$16 sps:$4 sm:$0xff]   ;;  %s2862_s16 = scalar_lea.vmem %s2861_s21, 1024  ;;  %p2863_p10 = scmp.lt.s32.totalorder %s1952_s12, %s2861_s21 }
  0x7d   : > { %1663 = vmatprep.subr.bf16.mxu1 %v2436_v17  ;;  %v2458_v32 = vld [vmem:[%s3148_s14 + $0x1e4] ss:$16 sps:$4 sm:$0xff]   ;;  %v2462_v34 = vld [vmem:[%s3148_s14 + $0x1e0] ss:$16 sps:$4 sm:$0xff]   ;;  %p2859_p3 = pneg %p2858_p4  ;;  %p2864_p8 = scmp.lt.s32.totalorder %s2862_s16, %s2856_s30 }
  0x7e   : > { %v2460_v33 = vld [vmem:[%s3148_s14 + $0x3e4] ss:$16 sps:$4 sm:$0xff]   ;;  %v2463_v35 = vld [vmem:[%s3148_s14 + $0x3e0] ss:$16 sps:$4 sm:$0xff]  }
  0x7f   : > { %1613 = vmatpush1.bf16.msra.mxu0 %v2438_v18  ;;  %v2464_v36 = vld [vmem:[%s3148_s14 + $0x1c4] ss:$16 sps:$4 sm:$0xff]   ;;  %v2468_v38 = vld [vmem:[%s3148_s14 + $0x1c0] ss:$16 sps:$4 sm:$0xff]   ;;  %p2865_p12 = por %p2864_p8, %p2863_p10 }
  0x80   : > { %1664 = vmatpush1.bf16.msra.mxu1 %v2439_v19  ;;  %1614 = vmatprep.subr.bf16.mxu0 %v2440_v20  ;;  %v2466_v37 = vld [vmem:[%s3148_s14 + $0x3c4] ss:$16 sps:$4 sm:$0xff]   ;;  %v2469_v39 = vld [vmem:[%s3148_s14 + $0x3c0] ss:$16 sps:$4 sm:$0xff]  }
  0x81   : > { %1665 = vmatprep.subr.bf16.mxu1 %v2442_v21  ;;  %v2470_v40 = vld [vmem:[%s3148_s14 + $0x1a4] ss:$16 sps:$4 sm:$0xff]   ;;  %v2474_v42 = vld [vmem:[%s3148_s14 + $0x1a0] ss:$16 sps:$4 sm:$0xff]   ;;  %p2866_p2 = pnand %p2865_p12, %p2859_p3 }
  0x82   : > { %v2472_v41 = vld [vmem:[%s3148_s14 + $0x3a4] ss:$16 sps:$4 sm:$0xff]   ;;  %v2475_v43 = vld [vmem:[%s3148_s14 + $0x3a0] ss:$16 sps:$4 sm:$0xff]  }
  0x83   : > { %1615 = vmatpush1.bf16.msra.mxu0 %v2444_v22  ;;  %v2476_v44 = vld [vmem:[%s3148_s14 + $0x184] ss:$16 sps:$4 sm:$0xff]   ;;  %v2480_v51 = vld [vmem:[%s3148_s14 + $0x180] ss:$16 sps:$4 sm:$0xff]  }
  0x84   : > { %1666 = vmatpush1.bf16.msra.mxu1 %v2445_v23  ;;  %1616 = vmatprep.subr.bf16.mxu0 %v2446_v24  ;;  %v2478_v45 = vld [vmem:[%s3148_s14 + $0x384] ss:$16 sps:$4 sm:$0xff]   ;;  %v2481_v52 = vld [vmem:[%s3148_s14 + $0x380] ss:$16 sps:$4 sm:$0xff]   ;;  %v2511_v23 = vld [vmem:[%s3148_s14 + $0xec] ss:$16 sps:$4 sm:$0xff]  }
  0x85   : > { %1667 = vmatprep.subr.bf16.mxu1 %v2448_v25  ;;  %v2482_v53 = vld [vmem:[%s3148_s14 + $0x164] ss:$16 sps:$4 sm:$0xff]   ;;  %v2486_v60 = vld [vmem:[%s3148_s14 + $0x160] ss:$16 sps:$4 sm:$0xff]  }
  0x86   : > { %v2484_v57 = vld [vmem:[%s3148_s14 + $0x364] ss:$16 sps:$4 sm:$0xff]   ;;  %v2487_v61 = vld [vmem:[%s3148_s14 + $0x360] ss:$16 sps:$4 sm:$0xff]  }
  0x87   : > { %1617 = vmatpush1.bf16.msra.mxu0 %v2450_v26  ;;  %v2488_v0 = vld [vmem:[%s3148_s14 + $0x144] ss:$16 sps:$4 sm:$0xff]   ;;  %v2492_v2 = vld [vmem:[%s3148_s14 + $0x140] ss:$16 sps:$4 sm:$0xff]  }
  0x88   : > { %1668 = vmatpush1.bf16.msra.mxu1 %v2451_v27  ;;  %1618 = vmatprep.subr.bf16.mxu0 %v2452_v28  ;;  %v2490_v1 = vld [vmem:[%s3148_s14 + $0x344] ss:$16 sps:$4 sm:$0xff]   ;;  %v2493_v3 = vld [vmem:[%s3148_s14 + $0x340] ss:$16 sps:$4 sm:$0xff]   ;;  %v2509_v27 = vld [vmem:[%s3148_s14 + $0xe8] ss:$16 sps:$4 sm:$0xff]  }
  0x89   : > { %1669 = vmatprep.subr.bf16.mxu1 %v2454_v29  ;;  %v2494_v4 = vld [vmem:[%s3148_s14 + $0x124] ss:$16 sps:$4 sm:$0xff]   ;;  %v2498_v8 = vld [vmem:[%s3148_s14 + $0x120] ss:$16 sps:$4 sm:$0xff]   ;;  %v2517_v29 = vld [vmem:[%s3148_s14 + $0xcc] ss:$16 sps:$4 sm:$0xff]  }
  0x8a   : > { %v2496_v5 = vld [vmem:[%s3148_s14 + $0x324] ss:$16 sps:$4 sm:$0xff]   ;;  %v2499_v9 = vld [vmem:[%s3148_s14 + $0x320] ss:$16 sps:$4 sm:$0xff]  }
  0x8b   : > { %1619 = vmatpush1.bf16.msra.mxu0 %v2456_v30  ;;  %v562_v6 = vld [vmem:[#allocation5] sm:$0xff]  ;;  %v564_v7 = vld [vmem:[#allocation5 + $0x10] sm:$0xff] }
  0x8c   : > { %1670 = vmatpush1.bf16.msra.mxu1 %v2457_v31  ;;  %1620 = vmatprep.subr.bf16.mxu0 %v2458_v32  ;;  %v2500_v10 = vld [vmem:[%s3148_s14 + $0x104] ss:$16 sps:$4 sm:$0xff]   ;;  %v568_v12 = vpack.c.bf16 %v562_v6, %v562_v6  ;;  %v570_v13 = vpack.c.bf16 %v564_v7, %v564_v7  ;;  %v2504_v16 = vld [vmem:[%s3148_s14 + $0x100] ss:$16 sps:$4 sm:$0xff]   ;;  %v2515_v31 = vld [vmem:[%s3148_s14 + $0xc8] ss:$16 sps:$4 sm:$0xff]  }
  0x8d   : > { %1671 = vmatprep.subr.bf16.mxu1 %v2460_v33  ;;  %v2502_v11 = vld [vmem:[%s3148_s14 + $0x304] ss:$16 sps:$4 sm:$0xff]   ;;  %v2505_v17 = vld [vmem:[%s3148_s14 + $0x300] ss:$16 sps:$4 sm:$0xff]   ;;  %v2523_v33 = vld [vmem:[%s3148_s14 + $0xac] ss:$16 sps:$4 sm:$0xff]  }
  0x8e   : > { %v550_v14 = vld [vmem:[#allocation2] sm:$0xff]  ;;  %v552_v15 = vld [vmem:[#allocation2 + $0x10] sm:$0xff]  ;;  %v592_v19 = vrot.slane %v568_v12, 4  ;;  %v594_v21 = vrot.slane %v570_v13, 4  ;;  %v2559_v7 = vld [vmem:[%s3148_s14 + $0x1ec] ss:$16 sps:$4 sm:$0xff]  }
  0x8f   : > { %1621 = vmatpush2.bf16.msra.mxu0 %v2462_v34  ;;  %v556_v18 = vpack.c.bf16 %v550_v14, %v550_v14  ;;  %v558_v20 = vpack.c.bf16 %v552_v15, %v552_v15  ;;  %v2508_v22 = vld [vmem:[%s3148_s14 + $0x4e4] ss:$16 sps:$4 sm:$0xff]   ;;  %v2506_v24 = vld [vmem:[%s3148_s14 + $0x4e0] ss:$16 sps:$4 sm:$0xff]   ;;  %v2565_v12 = vld [vmem:[%s3148_s14 + $0x1cc] ss:$16 sps:$4 sm:$0xff]  }
  0x90   : > { %1672 = vmatpush2.bf16.msra.mxu1 %v2463_v35  ;;  %1622 = vmatprep.subr.bf16.mxu0 %v2464_v36  ;;  %v2514_v28 = vld [vmem:[%s3148_s14 + $0x4c4] ss:$16 sps:$4 sm:$0xff]   ;;  %v2512_v30 = vld [vmem:[%s3148_s14 + $0x4c0] ss:$16 sps:$4 sm:$0xff]   ;;  %v2521_v35 = vld [vmem:[%s3148_s14 + $0xa8] ss:$16 sps:$4 sm:$0xff]  }
  0x91   : > { %1673 = vmatprep.subr.bf16.mxu1 %v2466_v37  ;;  %v3230_v25 = vsel %vm598_vm0, %v556_v18, %v592_v19  ;;  %v3233_v26 = vsel %vm598_vm0, %v558_v20, %v594_v21  ;;  %v2520_v32 = vld [vmem:[%s3148_s14 + $0x4a4] ss:$16 sps:$4 sm:$0xff]   ;;  %v2518_v34 = vld [vmem:[%s3148_s14 + $0x4a0] ss:$16 sps:$4 sm:$0xff]   ;;  %v2529_v37 = vld [vmem:[%s3148_s14 + $0x8c] ss:$16 sps:$4 sm:$0xff]  }
  0x92   : > { %v2526_v36 = vld [vmem:[%s3148_s14 + $0x484] ss:$16 sps:$4 sm:$0xff]   ;;  %v2542_v58 = vld [vmem:[%s3148_s14 + $0x420] ss:$16 sps:$4 sm:$0xff]   ;;  %v2563_v14 = vld [vmem:[%s3148_s14 + $0x1c8] ss:$16 sps:$4 sm:$0xff]  }
  0x93   : > { %1623 = vmatpush2.bf16.msra.mxu0 %v2468_v38  ;;  %v2524_v38 = vld [vmem:[%s3148_s14 + $0x480] ss:$16 sps:$4 sm:$0xff]   ;;  %v2544_v55 = vld [vmem:[%s3148_s14 + $0x424] ss:$16 sps:$4 sm:$0xff]   ;;  %v2569_v18 = vld [vmem:[%s3148_s14 + $0x1a8] ss:$16 sps:$4 sm:$0xff]  }
  0x94   : > { %1674 = vmatpush2.bf16.msra.mxu1 %v2469_v39  ;;  %1624 = vmatprep.subr.bf16.mxu0 %v2470_v40  ;;  %v2527_v39 = vld [vmem:[%s3148_s14 + $0x88] ss:$16 sps:$4 sm:$0xff]   ;;  %v2532_v40 = vld [vmem:[%s3148_s14 + $0x464] ss:$16 sps:$4 sm:$0xff]   ;;  %v2560_v13 = vld [vmem:[%s3148_s14 + $0x5c0] ss:$16 sps:$4 sm:$0xff]  }
  0x95   : > { %1675 = vmatprep.subr.bf16.mxu1 %v2472_v41  ;;  %v2535_v41 = vld [vmem:[%s3148_s14 + $0x6c] ss:$16 sps:$4 sm:$0xff]   ;;  %v574_v47 = vld [vmem:[#allocation7] sm:$0xff]  ;;  %v576_v54 = vld [vmem:[#allocation7 + $0x10] sm:$0xff] }
  0x96   : > { %v3258_v50 = vpack.c.bf16 %v574_v47, %v574_v47  ;;  %v2556_v6 = vld [vmem:[%s3148_s14 + $0x5e4] ss:$16 sps:$4 sm:$0xff]   ;;  %v2577_v20 = vld [vmem:[%s3148_s14 + $0x18c] ss:$16 sps:$4 sm:$0xff]   ;;  %v2572_v21 = vld [vmem:[%s3148_s14 + $0x580] ss:$16 sps:$4 sm:$0xff]  }
  0x97   : > { %1625 = vmatpush2.bf16.msra.mxu0 %v2474_v42  ;;  %v2530_v42 = vld [vmem:[%s3148_s14 + $0x460] ss:$16 sps:$4 sm:$0xff]   ;;  %v2568_v15 = vld [vmem:[%s3148_s14 + $0x5a4] ss:$16 sps:$4 sm:$0xff]   ;;  %v2607_v47 = vld [vmem:[%s3148_s14 + $0x4ec] ss:$16 sps:$4 sm:$0xff]  }
  0x98   : > { %1676 = vmatpush2.bf16.msra.mxu1 %v2475_v43  ;;  %1626 = vmatprep.subr.bf16.mxu0 %v2476_v44  ;;  %v2533_v43 = vld [vmem:[%s3148_s14 + $0x68] ss:$16 sps:$4 sm:$0xff]   ;;  %v2538_v44 = vld [vmem:[%s3148_s14 + $0x444] ss:$16 sps:$4 sm:$0xff]  }
  0x99   : > { %1677 = vmatprep.subr.bf16.mxu1 %v2478_v45  ;;  %v2541_v45 = vld [vmem:[%s3148_s14 + $0x4c] ss:$16 sps:$4 sm:$0xff]   ;;  %v2574_v19 = vld [vmem:[%s3148_s14 + $0x584] ss:$16 sps:$4 sm:$0xff]  }
  0x9b   : > { %1627 = vmatpush2.bf16.msra.mxu0 %v2480_v51  ;;  %v3260_v51 = vpack.c.bf16 %v577_v49, %v577_v49  ;;  %v2602_v49 = vld [vmem:[%s3148_s14 + $0x2e8] ss:$16 sps:$4 sm:$0xff]  }
  0x9c   : > { %1678 = vmatpush2.bf16.msra.mxu1 %v2481_v52  ;;  %1628 = vmatprep.subr.bf16.mxu0 %v2482_v53  ;;  %v2536_v52 = vld [vmem:[%s3148_s14 + $0x440] ss:$16 sps:$4 sm:$0xff]   ;;  %v2539_v53 = vld [vmem:[%s3148_s14 + $0x48] ss:$16 sps:$4 sm:$0xff]  }
  0x9d   : > { %1679 = vmatprep.subr.bf16.mxu1 %v2484_v57  ;;  %v3267_v57 = vpack.c.bf16 %v576_v54, %v576_v54 }
  0x9f   : > { %1629 = vmatpush2.bf16.msra.mxu0 %v2486_v60  ;;  %v2550_v60 = vld [vmem:[%s3148_s14 + $0x404] ss:$16 sps:$4 sm:$0xff]  }
  0xa0   : > { %1680 = vmatpush2.bf16.msra.mxu1 %v2487_v61  ;;  %1630 = vmatprep.subr.bf16.mxu0 %v2488_v0  ;;  %v2553_v61 = vld [vmem:[%s3148_s14 + $0xc] ss:$16 sps:$4 sm:$0xff]  }
  0xa1   : > { %1681 = vmatprep.subr.bf16.mxu1 %v2490_v1  ;;  %v555_v0 = vld [vmem:[#allocation2 + $0x28] sm:$0xff]  ;;  %v567_v1 = vld [vmem:[#allocation5 + $0x28] sm:$0xff] }
  0xa3   : > { %1631 = vmatpush2.bf16.msra.mxu0 %v2492_v2  ;;  %v2548_v2 = vld [vmem:[%s3148_s14 + $0x400] ss:$16 sps:$4 sm:$0xff]  }
  0xa4   : > { %1682 = vmatpush2.bf16.msra.mxu1 %v2493_v3  ;;  %1632 = vmatprep.subr.bf16.mxu0 %v2494_v4  ;;  %v561_v3 = vpack.c.bf16 %v555_v0, %v555_v0  ;;  %v573_v4 = vpack.c.bf16 %v567_v1, %v567_v1  ;;  %v2616_v0 = vld [vmem:[%s3148_s14 + $0x2ac] ss:$16 sps:$4 sm:$0xff]  }
  0xa5   : > { %1683 = vmatprep.subr.bf16.mxu1 %v2496_v5  ;;  %v2551_v5 = vld [vmem:[%s3148_s14 + $0x8] ss:$16 sps:$4 sm:$0xff]   ;;  %v2619_v1 = vld [vmem:[%s3148_s14 + $0x4ac] ss:$16 sps:$4 sm:$0xff]  }
  0xa7   : > { %1633 = vmatpush2.bf16.msra.mxu0 %v2498_v8  ;;  %v597_v8 = vrot.slane %v573_v4, 4  ;;  %v2622_v4 = vld [vmem:[%s3148_s14 + $0x28c] ss:$16 sps:$4 sm:$0xff]  }
  0xa8   : > { %1684 = vmatpush2.bf16.msra.mxu1 %v2499_v9  ;;  %1634 = vmatprep.subr.bf16.mxu0 %v2500_v10  ;;  %v2557_v10 = vld [vmem:[%s3148_s14 + $0x1e8] ss:$16 sps:$4 sm:$0xff]  }
  0xa9   : > { %1685 = vmatprep.subr.bf16.mxu1 %v2502_v11  ;;  %v3282_v9 = vsel %vm598_vm0, %v561_v3, %v597_v8  ;;  %v2562_v11 = vld [vmem:[%s3148_s14 + $0x5c4] ss:$16 sps:$4 sm:$0xff]   ;;  %v2617_v3 = vld [vmem:[%s3148_s14 + $0x4a8] ss:$16 sps:$4 sm:$0xff]   ;;  %v2631_v8 = vld [vmem:[%s3148_s14 + $0x46c] ss:$16 sps:$4 sm:$0xff]  }
  0xab   : > { %1635 = vmatpush2.bf16.msra.mxu0 %v2504_v16  ;;  %v2571_v16 = vld [vmem:[%s3148_s14 + $0x1ac] ss:$16 sps:$4 sm:$0xff]  }
  0xac   : > { %1686 = vmatpush2.bf16.msra.mxu1 %v2505_v17  ;;  %1706 = vmatprep.subr.bf16.mxu0 %v2508_v22  ;;  %v2566_v17 = vld [vmem:[%s3148_s14 + $0x5a0] ss:$16 sps:$4 sm:$0xff]   ;;  %v2575_v22 = vld [vmem:[%s3148_s14 + $0x188] ss:$16 sps:$4 sm:$0xff]  }
  0xad   : > { %1757 = vmatprep.subr.bf16.mxu1 %v2511_v23  ;;  %v2580_v23 = vld [vmem:[%s3148_s14 + $0x564] ss:$16 sps:$4 sm:$0xff]  }
  0xae   : > { %1637 = vmatmul.mubr.bf16.vlgmr.msra.gmra.mxu0 %v3230_v25 }
  0xaf   : > { %1688 = vmatmul.mubr.bf16.vlgmr.msra.gmra.mxu1 %v3233_v26  ;;  %1707 = vmatpush1.bf16.msra.mxu0 %v2506_v24  ;;  %v2583_v24 = vld [vmem:[%s3148_s14 + $0x16c] ss:$16 sps:$4 sm:$0xff]  }
  0xb0   : > { %1758 = vmatpush1.bf16.msra.mxu1 %v2509_v27  ;;  %1708 = vmatprep.subr.bf16.mxu0 %v2514_v28  ;;  %v2578_v27 = vld [vmem:[%s3148_s14 + $0x560] ss:$16 sps:$4 sm:$0xff]   ;;  %v2581_v28 = vld [vmem:[%s3148_s14 + $0x168] ss:$16 sps:$4 sm:$0xff]  }
  0xb1   : > { %1759 = vmatprep.subr.bf16.mxu1 %v2517_v29  ;;  %1646 = vmatprep.mubr.bf16.mxu0 %v3256_v48  ;;  %v2586_v29 = vld [vmem:[%s3148_s14 + $0x544] ss:$16 sps:$4 sm:$0xff]  }
  0xb2   : > { %1697 = vmatprep.mubr.bf16.mxu1 %v3260_v51 }
  0xb3   : > { %1709 = vmatpush1.bf16.msra.mxu0 %v2512_v30  ;;  %v2589_v30 = vld [vmem:[%s3148_s14 + $0x14c] ss:$16 sps:$4 sm:$0xff]  }
  0xb4   : > { %1760 = vmatpush1.bf16.msra.mxu1 %v2515_v31  ;;  %1710 = vmatprep.subr.bf16.mxu0 %v2520_v32  ;;  %v2584_v31 = vld [vmem:[%s3148_s14 + $0x540] ss:$16 sps:$4 sm:$0xff]   ;;  %v2587_v32 = vld [vmem:[%s3148_s14 + $0x148] ss:$16 sps:$4 sm:$0xff]  }
  0xb5   : > { %1761 = vmatprep.subr.bf16.mxu1 %v2523_v33  ;;  %v2592_v33 = vld [vmem:[%s3148_s14 + $0x524] ss:$16 sps:$4 sm:$0xff]  }
  0xb6   : > { %1647 = vmatmul.mubr.bf16.gmra.mxu0 %v3258_v50 }
  0xb7   : > { %1711 = vmatpush1.bf16.msra.mxu0 %v2518_v34  ;;  %1698 = vmatmul.mubr.bf16.gmra.mxu1 %v3267_v57  ;;  %v2595_v34 = vld [vmem:[%s3148_s14 + $0x12c] ss:$16 sps:$4 sm:$0xff]  }
  0xb8   : > { %1762 = vmatpush1.bf16.msra.mxu1 %v2521_v35  ;;  %1712 = vmatprep.subr.bf16.mxu0 %v2526_v36  ;;  %v566_v35 = vld [vmem:[#allocation5 + $0x20] sm:$0xff] }
  0xb9   : > { %1763 = vmatprep.subr.bf16.mxu1 %v2529_v37  ;;  %1789 = vmatprep.mubr.bf16.mxu1 %v3207_v62  ;;  %v2554_v62 = vld [vmem:[%s3148_s14 + $0x5e0] ss:$16 sps:$4 sm:$0xff]   ;;  %v2593_v37 = vld [vmem:[%s3148_s14 + $0x128] ss:$16 sps:$4 sm:$0xff]  }
  0xba   : > { %1738 = vmatprep.mubr.bf16.mxu0 %v3282_v9  ;;  %v2590_v36 = vld [vmem:[%s3148_s14 + $0x520] ss:$16 sps:$4 sm:$0xff]  }
  0xbb   : > { %1713 = vmatpush1.bf16.msra.mxu0 %v2524_v38  ;;  %v2598_v38 = vld [vmem:[%s3148_s14 + $0x504] ss:$16 sps:$4 sm:$0xff]  }
  0xbc   : > { %1764 = vmatpush1.bf16.msra.mxu1 %v2527_v39  ;;  %1714 = vmatprep.subr.bf16.mxu0 %v2532_v40  ;;  %v2601_v39 = vld [vmem:[%s3148_s14 + $0x10c] ss:$16 sps:$4 sm:$0xff]   ;;  %v572_v40 = vpack.c.bf16 %v566_v35, %v566_v35 }
  0xbd   : > { %1765 = vmatprep.subr.bf16.mxu1 %v2535_v41  ;;  %v554_v41 = vld [vmem:[#allocation2 + $0x20] sm:$0xff]  ;;  %v2673_v35 = vld [vmem:[%s3148_s14 + $0x58c] ss:$16 sps:$4 sm:$0xff]  }
  0xbf   : > { %1715 = vmatpush1.bf16.msra.mxu0 %v2530_v42  ;;  %v2596_v42 = vld [vmem:[%s3148_s14 + $0x500] ss:$16 sps:$4 sm:$0xff]  }
  0xc0   : > { %1766 = vmatpush1.bf16.msra.mxu1 %v2533_v43  ;;  %1716 = vmatprep.subr.bf16.mxu0 %v2538_v44  ;;  %v2599_v43 = vld [vmem:[%s3148_s14 + $0x108] ss:$16 sps:$4 sm:$0xff]   ;;  %v560_v44 = vpack.c.bf16 %v554_v41, %v554_v41 }
  0xc1   : > { %1767 = vmatprep.subr.bf16.mxu1 %v2541_v45  ;;  %v596_v45 = vrot.slane %v572_v40, 4  ;;  %v2674_v40 = vld [vmem:[%s3148_s14 + $0x368] ss:$16 sps:$4 sm:$0xff]  }
  0xc2   : > { %v2677_v41 = vld [vmem:[%s3148_s14 + $0x568] ss:$16 sps:$4 sm:$0xff]  }
  0xc3   : > { %1717 = vmatpush1.bf16.msra.mxu0 %v2536_v52  ;;  %v2605_v52 = vld [vmem:[%s3148_s14 + $0x4e8] ss:$16 sps:$4 sm:$0xff]   ;;  %v3320_v54 = vsel %vm598_vm0, %v560_v44, %v596_v45 }
  0xc4   : > { %1768 = vmatpush1.bf16.msra.mxu1 %v2539_v53  ;;  %1718 = vmatprep.subr.bf16.mxu0 %v2544_v55  ;;  %v579_v53 = vld [vmem:[#allocation7 + $0x28] sm:$0xff] }
  0xc5   : > { %1769 = vmatprep.subr.bf16.mxu1 %v2547_v56  ;;  %v2610_v55 = vld [vmem:[%s3148_s14 + $0x2cc] ss:$16 sps:$4 sm:$0xff]   ;;  %v2680_v44 = vld [vmem:[%s3148_s14 + $0x348] ss:$16 sps:$4 sm:$0xff]  }
  0xc6   : > { %v2613_v56 = vld [vmem:[%s3148_s14 + $0x4cc] ss:$16 sps:$4 sm:$0xff]   ;;  %v2683_v45 = vld [vmem:[%s3148_s14 + $0x548] ss:$16 sps:$4 sm:$0xff]  }
  0xc7   : > { %1719 = vmatpush1.bf16.msra.mxu0 %v2542_v58  ;;  %v2608_v58 = vld [vmem:[%s3148_s14 + $0x2c8] ss:$16 sps:$4 sm:$0xff]  }
  0xc8   : > { %1770 = vmatpush1.bf16.msra.mxu1 %v2545_v59  ;;  %1720 = vmatprep.subr.bf16.mxu0 %v2550_v60  ;;  %v3325_v59 = vpack.c.bf16 %v579_v53, %v579_v53  ;;  %v2611_v60 = vld [vmem:[%s3148_s14 + $0x4c8] ss:$16 sps:$4 sm:$0xff]   ;;  %v2694_v53 = vld [vmem:[%s3148_s14 + $0x30c] ss:$16 sps:$4 sm:$0xff]  }
  0xc9   : > { %1771 = vmatprep.subr.bf16.mxu1 %v2553_v61  ;;  %v578_v61 = vld [vmem:[#allocation7 + $0x20] sm:$0xff] }
  0xcb   : > { %1721 = vmatpush1.bf16.msra.mxu0 %v2548_v2  ;;  %v3334_v2 = vpack.c.bf16 %v578_v61, %v578_v61 }
  0xcc   : > { %1772 = vmatpush1.bf16.msra.mxu1 %v2551_v5  ;;  %1722 = vmatprep.subr.bf16.mxu0 %v2556_v6  ;;  %v2625_v5 = vld [vmem:[%s3148_s14 + $0x48c] ss:$16 sps:$4 sm:$0xff]   ;;  %v2623_v6 = vld [vmem:[%s3148_s14 + $0x488] ss:$16 sps:$4 sm:$0xff]  }
  0xcd   : > { %1773 = vmatprep.subr.bf16.mxu1 %v2559_v7  ;;  %v2628_v7 = vld [vmem:[%s3148_s14 + $0x26c] ss:$16 sps:$4 sm:$0xff]  }
  0xcf   : > { %1723 = vmatpush2.bf16.msra.mxu0 %v2554_v62  ;;  %v2629_v62 = vld [vmem:[%s3148_s14 + $0x468] ss:$16 sps:$4 sm:$0xff]  }
  0xd0   : > { %1774 = vmatpush2.bf16.msra.mxu1 %v2557_v10  ;;  %1724 = vmatprep.subr.bf16.mxu0 %v2562_v11  ;;  %v2634_v10 = vld [vmem:[%s3148_s14 + $0x24c] ss:$16 sps:$4 sm:$0xff]  }
  0xd1   : > { %1775 = vmatprep.subr.bf16.mxu1 %v2565_v12  ;;  %v2637_v11 = vld [vmem:[%s3148_s14 + $0x44c] ss:$16 sps:$4 sm:$0xff]   ;;  %v2632_v12 = vld [vmem:[%s3148_s14 + $0x248] ss:$16 sps:$4 sm:$0xff]  }
  0xd3   : > { %1725 = vmatpush2.bf16.msra.mxu0 %v2560_v13  ;;  %v2643_v13 = vld [vmem:[%s3148_s14 + $0x42c] ss:$16 sps:$4 sm:$0xff]  }
  0xd4   : > { %1776 = vmatpush2.bf16.msra.mxu1 %v2563_v14  ;;  %1726 = vmatprep.subr.bf16.mxu0 %v2568_v15  ;;  %v2638_v14 = vld [vmem:[%s3148_s14 + $0x228] ss:$16 sps:$4 sm:$0xff]  }
  0xd5   : > { %1777 = vmatprep.subr.bf16.mxu1 %v2571_v16  ;;  %v2641_v15 = vld [vmem:[%s3148_s14 + $0x428] ss:$16 sps:$4 sm:$0xff]   ;;  %v2646_v16 = vld [vmem:[%s3148_s14 + $0x20c] ss:$16 sps:$4 sm:$0xff]  }
  0xd7   : > { %1727 = vmatpush2.bf16.msra.mxu0 %v2566_v17  ;;  %v2649_v17 = vld [vmem:[%s3148_s14 + $0x40c] ss:$16 sps:$4 sm:$0xff]  }
  0xd8   : > { %1778 = vmatpush2.bf16.msra.mxu1 %v2569_v18  ;;  %1728 = vmatprep.subr.bf16.mxu0 %v2574_v19  ;;  %v2644_v18 = vld [vmem:[%s3148_s14 + $0x208] ss:$16 sps:$4 sm:$0xff]  }
  0xd9   : > { %1779 = vmatprep.subr.bf16.mxu1 %v2577_v20  ;;  %v2647_v19 = vld [vmem:[%s3148_s14 + $0x408] ss:$16 sps:$4 sm:$0xff]   ;;  %v2652_v20 = vld [vmem:[%s3148_s14 + $0x3ec] ss:$16 sps:$4 sm:$0xff]  }
  0xdb   : > { %1729 = vmatpush2.bf16.msra.mxu0 %v2572_v21  ;;  %v2655_v21 = vld [vmem:[%s3148_s14 + $0x5ec] ss:$16 sps:$4 sm:$0xff]  }
  0xdc   : > { %1780 = vmatpush2.bf16.msra.mxu1 %v2575_v22  ;;  %1730 = vmatprep.subr.bf16.mxu0 %v2580_v23  ;;  %v2650_v22 = vld [vmem:[%s3148_s14 + $0x3e8] ss:$16 sps:$4 sm:$0xff]  }
  0xdd   : > { %1781 = vmatprep.subr.bf16.mxu1 %v2583_v24  ;;  %v2653_v23 = vld [vmem:[%s3148_s14 + $0x5e8] ss:$16 sps:$4 sm:$0xff]   ;;  %v2658_v24 = vld [vmem:[%s3148_s14 + $0x3cc] ss:$16 sps:$4 sm:$0xff]  }
  0xdf   : > { %1731 = vmatpush2.bf16.msra.mxu0 %v2578_v27  ;;  %v2661_v27 = vld [vmem:[%s3148_s14 + $0x5cc] ss:$16 sps:$4 sm:$0xff]  }
  0xe0   : > { %1782 = vmatpush2.bf16.msra.mxu1 %v2581_v28  ;;  %1732 = vmatprep.subr.bf16.mxu0 %v2586_v29  ;;  %v2656_v28 = vld [vmem:[%s3148_s14 + $0x3c8] ss:$16 sps:$4 sm:$0xff]  }
  0xe1   : > { %1783 = vmatprep.subr.bf16.mxu1 %v2589_v30  ;;  %v2659_v29 = vld [vmem:[%s3148_s14 + $0x5c8] ss:$16 sps:$4 sm:$0xff]   ;;  %v2664_v30 = vld [vmem:[%s3148_s14 + $0x3ac] ss:$16 sps:$4 sm:$0xff]  }
  0xe3   : > { %1733 = vmatpush2.bf16.msra.mxu0 %v2584_v31  ;;  %v2667_v31 = vld [vmem:[%s3148_s14 + $0x5ac] ss:$16 sps:$4 sm:$0xff]  }
  0xe4   : > { %1784 = vmatpush2.bf16.msra.mxu1 %v2587_v32  ;;  %1734 = vmatprep.subr.bf16.mxu0 %v2592_v33  ;;  %v2662_v32 = vld [vmem:[%s3148_s14 + $0x3a8] ss:$16 sps:$4 sm:$0xff]  }
  0xe5   : > { %1785 = vmatprep.subr.bf16.mxu1 %v2595_v34  ;;  %v2665_v33 = vld [vmem:[%s3148_s14 + $0x5a8] ss:$16 sps:$4 sm:$0xff]   ;;  %v2670_v34 = vld [vmem:[%s3148_s14 + $0x38c] ss:$16 sps:$4 sm:$0xff]  }
  0xe7   : > { %1735 = vmatpush2.bf16.msra.mxu0 %v2590_v36  ;;  %v2668_v36 = vld [vmem:[%s3148_s14 + $0x388] ss:$16 sps:$4 sm:$0xff]  }
  0xe8   : > { %1786 = vmatpush2.bf16.msra.mxu1 %v2593_v37  ;;  %1736 = vmatprep.subr.bf16.mxu0 %v2598_v38  ;;  %v2671_v37 = vld [vmem:[%s3148_s14 + $0x588] ss:$16 sps:$4 sm:$0xff]   ;;  %v2676_v38 = vld [vmem:[%s3148_s14 + $0x36c] ss:$16 sps:$4 sm:$0xff]  }
  0xe9   : > { %1787 = vmatprep.subr.bf16.mxu1 %v2601_v39  ;;  %v2679_v39 = vld [vmem:[%s3148_s14 + $0x56c] ss:$16 sps:$4 sm:$0xff]  }
  0xeb   : > { %1737 = vmatpush2.bf16.msra.mxu0 %v2596_v42  ;;  %v2682_v42 = vld [vmem:[%s3148_s14 + $0x34c] ss:$16 sps:$4 sm:$0xff]  }
  0xec   : > { %1788 = vmatpush2.bf16.msra.mxu1 %v2599_v43  ;;  %1808 = vmatprep.subr.bf16.mxu0 %v2604_v46  ;;  %v2685_v43 = vld [vmem:[%s3148_s14 + $0x54c] ss:$16 sps:$4 sm:$0xff]  }
  0xed   : > { %1859 = vmatprep.subr.bf16.mxu1 %v2607_v47  ;;  %v2688_v46 = vld [vmem:[%s3148_s14 + $0x32c] ss:$16 sps:$4 sm:$0xff]  }
  0xee   : > { %1739 = vmatmul.mubr.bf16.vlgmr.msra.gmra.mxu0 %v3320_v54  ;;  %v2691_v47 = vld [vmem:[%s3148_s14 + $0x52c] ss:$16 sps:$4 sm:$0xff]  }
  0xef   : > { %1790 = vmatmul.mubr.bf16.vlgmr.msra.gmra.mxu1 %v3230_v25  ;;  %1809 = vmatpush1.bf16.msra.mxu0 %v2602_v49  ;;  %v2614_v25 = vld [vmem:[%s3148_s14 + $0x2a8] ss:$16 sps:$4 sm:$0xff]  }
  0xf0   : > { %1860 = vmatpush1.bf16.msra.mxu1 %v2605_v52  ;;  %1810 = vmatprep.subr.bf16.mxu0 %v2610_v55  ;;  %v2686_v49 = vld [vmem:[%s3148_s14 + $0x328] ss:$16 sps:$4 sm:$0xff]   ;;  %v2697_v55 = vld [vmem:[%s3148_s14 + $0x50c] ss:$16 sps:$4 sm:$0xff]  }
  0xf1   : > { %1861 = vmatprep.subr.bf16.mxu1 %v2613_v56  ;;  %1748 = vmatprep.mubr.bf16.mxu0 %v3325_v59  ;;  %v2689_v52 = vld [vmem:[%s3148_s14 + $0x528] ss:$16 sps:$4 sm:$0xff]  }
  0xf2   : > { %1799 = vmatprep.mubr.bf16.mxu1 %v3256_v48  ;;  %v2620_v48 = vld [vmem:[%s3148_s14 + $0x288] ss:$16 sps:$4 sm:$0xff]  }
  0xf3   : > { %1811 = vmatpush1.bf16.msra.mxu0 %v2608_v58  ;;  %v2692_v56 = vld [vmem:[%s3148_s14 + $0x308] ss:$16 sps:$4 sm:$0xff]  }
  0xf4   : > { %1862 = vmatpush1.bf16.msra.mxu1 %v2611_v60  ;;  %1812 = vmatprep.subr.bf16.mxu0 %v2616_v0  ;;  %v2695_v58 = vld [vmem:[%s3148_s14 + $0x508] ss:$16 sps:$4 sm:$0xff]  }
  0xf5   : > { %1863 = vmatprep.subr.bf16.mxu1 %v2619_v1 }
  0xf6   : > { %1749 = vmatmul.mubr.bf16.gmra.mxu0 %v3334_v2 }
  0xf7   : > { %1800 = vmatmul.mubr.bf16.gmra.mxu1 %v3258_v50  ;;  %1813 = vmatpush1.bf16.msra.mxu0 %v2614_v25  ;;  %v2626_v50 = vld [vmem:[%s3148_s14 + $0x268] ss:$16 sps:$4 sm:$0xff]  }
  0xf8   : > { %1864 = vmatpush1.bf16.msra.mxu1 %v2617_v3  ;;  %1814 = vmatprep.subr.bf16.mxu0 %v2622_v4 }
  0xf9   : > { %1865 = vmatprep.subr.bf16.mxu1 %v2625_v5  ;;  %1840 = vmatprep.mubr.bf16.mxu0 %v3210_v63  ;;  %v2635_v63 = vld [vmem:[%s3148_s14 + $0x448] ss:$16 sps:$4 sm:$0xff]  }
  0xfa   : > { %1891 = vmatprep.mubr.bf16.mxu1 %v3282_v9  ;;  %v2640_v9 = vld [vmem:[%s3148_s14 + $0x22c] ss:$16 sps:$4 sm:$0xff]  }
  0xfb   : > { %1815 = vmatpush1.bf16.msra.mxu0 %v2620_v48 }
  0xfc   : > { %1866 = vmatpush1.bf16.msra.mxu1 %v2623_v6  ;;  %1816 = vmatprep.subr.bf16.mxu0 %v2628_v7 }
  0xfd   : > { %1867 = vmatprep.subr.bf16.mxu1 %v2631_v8 }
  0xff   : > { %1817 = vmatpush1.bf16.msra.mxu0 %v2626_v50 }
 0x100   : > { %1868 = vmatpush1.bf16.msra.mxu1 %v2629_v62  ;;  %1818 = vmatprep.subr.bf16.mxu0 %v2634_v10  ;;  %v549_v62 = vld [vmem:[%s322_s28] sm:$0xf] }
 0x101   : > { %1869 = vmatprep.subr.bf16.mxu1 %v2637_v11 }
 0x103   : > { %1819 = vmatpush1.bf16.msra.mxu0 %v2632_v12 }
 0x104   : > { %1870 = vmatpush1.bf16.msra.mxu1 %v2635_v63  ;;  %1820 = vmatprep.subr.bf16.mxu0 %v2640_v9 }
 0x105   : > { %1871 = vmatprep.subr.bf16.mxu1 %v2643_v13 }
 0x107   : > { %1821 = vmatpush1.bf16.msra.mxu0 %v2638_v14 }
 0x108   : > { %1872 = vmatpush1.bf16.msra.mxu1 %v2641_v15  ;;  %1822 = vmatprep.subr.bf16.mxu0 %v2646_v16 }
 0x109   : > { %1873 = vmatprep.subr.bf16.mxu1 %v2649_v17 }
 0x10b   : > { %1823 = vmatpush1.bf16.msra.mxu0 %v2644_v18 }
 0x10c   : > { %1874 = vmatpush1.bf16.msra.mxu1 %v2647_v19  ;;  %1824 = vmatprep.subr.bf16.mxu0 %v2652_v20 }
 0x10d   : > { %1875 = vmatprep.subr.bf16.mxu1 %v2655_v21 }
 0x10f   : > { %1825 = vmatpush2.bf16.msra.mxu0 %v2650_v22 }
 0x110   : > { %1876 = vmatpush2.bf16.msra.mxu1 %v2653_v23  ;;  %1826 = vmatprep.subr.bf16.mxu0 %v2658_v24 }
 0x111   : > { %1877 = vmatprep.subr.bf16.mxu1 %v2661_v27 }
 0x113   : > { %1827 = vmatpush2.bf16.msra.mxu0 %v2656_v28 }
 0x114   : > { %1878 = vmatpush2.bf16.msra.mxu1 %v2659_v29  ;;  %1828 = vmatprep.subr.bf16.mxu0 %v2664_v30 }
 0x115   : > { %1879 = vmatprep.subr.bf16.mxu1 %v2667_v31 }
 0x117   : > { %1829 = vmatpush2.bf16.msra.mxu0 %v2662_v32 }
 0x118   : > { %1880 = vmatpush2.bf16.msra.mxu1 %v2665_v33  ;;  %1830 = vmatprep.subr.bf16.mxu0 %v2670_v34 }
 0x119   : > { %1881 = vmatprep.subr.bf16.mxu1 %v2673_v35 }
 0x11b   : > { %1831 = vmatpush2.bf16.msra.mxu0 %v2668_v36 }
 0x11c   : > { %1882 = vmatpush2.bf16.msra.mxu1 %v2671_v37  ;;  %1832 = vmatprep.subr.bf16.mxu0 %v2676_v38 }
 0x11d   : > { %1883 = vmatprep.subr.bf16.mxu1 %v2679_v39 }
 0x11f   : > { %1833 = vmatpush2.bf16.msra.mxu0 %v2674_v40 }
 0x120   : > { %1884 = vmatpush2.bf16.msra.mxu1 %v2677_v41  ;;  %1834 = vmatprep.subr.bf16.mxu0 %v2682_v42 }
 0x121   : > { %1885 = vmatprep.subr.bf16.mxu1 %v2685_v43 }
 0x123   : > { %1835 = vmatpush2.bf16.msra.mxu0 %v2680_v44 }
 0x124   : > { %1886 = vmatpush2.bf16.msra.mxu1 %v2683_v45  ;;  %1836 = vmatprep.subr.bf16.mxu0 %v2688_v46 }
 0x125   : > { %1887 = vmatprep.subr.bf16.mxu1 %v2691_v47 }
 0x127   : > { %1837 = vmatpush2.bf16.msra.mxu0 %v2686_v49 }
 0x128   : > { %1888 = vmatpush2.bf16.msra.mxu1 %v2689_v52  ;;  %1838 = vmatprep.subr.bf16.mxu0 %v2694_v53 }
 0x129   : > { %1889 = vmatprep.subr.bf16.mxu1 %v2697_v55 }
 0x12b   : > { %1839 = vmatpush2.bf16.msra.mxu0 %v2692_v56 }
 0x12c   : > { %1890 = vmatpush2.bf16.msra.mxu1 %v2695_v58 }
 0x12e   : > { %1841 = vmatmul.mubr.bf16.vlgmr.msra.gmra.mxu0 %v3233_v26 }
 0x12f   : > { %1892 = vmatmul.mubr.bf16.vlgmr.msra.gmra.mxu1 %v3320_v54  ;;  %1850 = vmatprep.mubr.bf16.mxu0 %v3260_v51 }
 0x130   : > { %1901 = vmatprep.mubr.bf16.mxu1 %v3325_v59 }
 0x136   : > { %1851 = vmatmul.mubr.bf16.gmra.mxu0 %v3267_v57  ;;  %v624_v57 = vlaneseq }
 0x137   : > { %1902 = vmatmul.mubr.bf16.gmra.mxu1 %v3334_v2 }
 0x138   : > { %v625_v2 = vshrl.u32 %v624_v57, 7 }
 0x13a   : > { %v626_v50 = vsub.s32 0, %v625_v2  ;;  %v634_v10 = vsub.s32 2, %v625_v2  ;;  %v638_v12 = vsub.s32 3, %v625_v2  ;;  %v630_v63 = vsub.s32 1, %v625_v2 }
 0x13c   : > { %v627_v11 = vrot.slane %v549_v62, %v626_v50  ;;  %v3401_v9 = vrot.slane %v549_v62, %v634_v10  ;;  %v3403_v14 = vrot.slane %v549_v62, %v638_v12  ;;  %v631_v15 = vrot.slane %v549_v62, %v630_v63 }
 0x16e   : > { %v1638_v60 = vpop.f32.mrf.mxu0 }
 0x16f   : > { %v1689_v61 = vpop.f32.mrf.mxu1  ;;  %v1639_v13 = vadd.f32 %v1638_v60, %v627_v11 }
 0x170   : > { %v1640_v0 = vpop.f32.mrf.mxu0 }
 0x171   : > { %v1691_v1 = vpop.f32.mrf.mxu1  ;;  %v1690_v23 = vadd.f32 %v1689_v61, %v1639_v13  ;;  %v1641_v31 = vadd.f32 %v1640_v0, %v631_v15 }
 0x172   : > { %v1642_v25 = vpop.f32.mrf.mxu0 }
 0x173   : > { %v1693_v3 = vpop.f32.mrf.mxu1  ;;  %v1643_v16 = vadd.f32 %v1642_v25, %v627_v11  ;;  %v1692_v44 = vadd.f32 %v1691_v1, %v1641_v31 }
 0x174   : > { %v1644_v4 = vpop.f32.mrf.mxu0 }
 0x175   : > { %v1695_v5 = vpop.f32.mrf.mxu1  ;;  %v1645_v20 = vadd.f32 %v1644_v4, %v631_v15  ;;  %v1694_v28 = vadd.f32 %v1693_v3, %v1643_v16 }
 0x176   : > { %v1648_v26 = vpop.f32.mrf.mxu0 }
 0x177   : > { %v1699_v48 = vpop.f32.mrf.mxu1  ;;  %v1649_v24 = vadd.f32 %v1648_v26, %v627_v11  ;;  %v1696_v35 = vadd.f32 %v1695_v5, %v1645_v20 }
 0x178   : > { %v1650_v54 = vpop.f32.mrf.mxu0 }
 0x179   : > { %v1701_v6 = vpop.f32.mrf.mxu1  ;;  %v1651_v32 = vadd.f32 %v1650_v54, %v631_v15  ;;  %v1700_v39 = vadd.f32 %v1699_v48, %v1649_v24 }
 0x17a   : > { %v1652_v51 = vpop.f32.mrf.mxu0 }
 0x17b   : > { %v1703_v7 = vpop.f32.mrf.mxu1  ;;  %v1702_v45 = vadd.f32 %v1701_v6, %v1651_v32 }
 0x17c   : > { %v1653_v59 = vpop.f32.mrf.mxu0 }
 0x17d   : > { %v1704_v8 = vpop.f32.mrf.mxu1 }
 0x1ae   : > { %v1740_v17 = vpop.f32.mrf.mxu0 }
 0x1af   : > { %v1791_v18 = vpop.f32.mrf.mxu1  ;;  %v1741_v33 = vadd.f32 %v1740_v17, %v1690_v23 }
 0x1b0   : > { %v1792_v19 = vadd.f32 %v1791_v18, %v3401_v9  ;;  %v1742_v21 = vpop.f32.mrf.mxu0 }
 0x1b1   : > { %v1793_v22 = vpop.f32.mrf.mxu1  ;;  %2698 = vtanh.f32 %v1741_v33  ;;  %v1743_v52 = vadd.f32 %v1742_v21, %v1692_v44 }
 0x1b2   : > { %v3407_v27 = vadd.f32 %v1793_v22, %v3403_v14  ;;  %v1744_v29 = vpop.f32.mrf.mxu0 }
 0x1b3   : > { %v1795_v30 = vpop.f32.mrf.mxu1  ;;  %v1745_v36 = vadd.f32 %v1744_v29, %v1694_v28 }
 0x1b4   : > { %v1796_v34 = vadd.f32 %v1795_v30, %v3401_v9  ;;  %v1746_v37 = vpop.f32.mrf.mxu0 }
 0x1b5   : > { %v1797_v38 = vpop.f32.mrf.mxu1  ;;  %v1747_v41 = vadd.f32 %v1746_v37, %v1696_v35  ;;  %2700 = vtanh.f32 %v1745_v36 }
 0x1b6   : > { %v1798_v40 = vadd.f32 %v1797_v38, %v3403_v14  ;;  %v1750_v42 = vpop.f32.mrf.mxu0 }
 0x1b7   : > { %v1801_v43 = vpop.f32.mrf.mxu1  ;;  %v1751_v46 = vadd.f32 %v1750_v42, %v1700_v39 }
 0x1b8   : > { %v1752_v47 = vpop.f32.mrf.mxu0  ;;  %v1802_v11 = vadd.f32 %v1801_v43, %v3401_v9 }
 0x1b9   : > { %v1803_v49 = vpop.f32.mrf.mxu1  ;;  %2702 = vtanh.f32 %v1751_v46  ;;  %v1753_v53 = vadd.f32 %v1752_v47, %v1702_v45 }
 0x1ba   : > { %2704 = vtanh.f32 %v1747_v41  ;;  %v1754_v55 = vpop.f32.mrf.mxu0  ;;  %v1804_v17 = vadd.f32 %v1803_v49, %v3403_v14 }
 0x1bb   : > { %v1805_v56 = vpop.f32.mrf.mxu1  ;;  %2706 = vtanh.f32 %v1753_v53 }
 0x1bc   : > { %v1755_v58 = vpop.f32.mrf.mxu0  ;;  %2708 = vtanh.f32 %v1743_v52 }
 0x1bd   : > { %v1806_v60 = vpop.f32.mrf.mxu1 }
 0x1be   : > { %v2699_v61 = vpop.eup %2698 }
 0x1c2   : > { %v2701_v0 = vpop.eup %2700 }
 0x1c6   : > { %v2703_v1 = vpop.eup %2702 }
 0x1c7   : > { %v2705_v25 = vpop.eup %2704  ;;  %v1922_v3 = vsub.f32 %v2701_v0, %v2703_v1 }
 0x1c8   : > { %v2707_v4 = vpop.eup %2706 }
 0x1c9   : > { %v1926_v5 = vadd.f32 %v2699_v61, %v1922_v3  ;;  %v1923_v26 = vsub.f32 %v2705_v25, %v2707_v4  ;;  %v2709_v48 = vpop.eup %2708 }
 0x1cb   : > { %v1927_v54 = vadd.f32 %v2709_v48, %v1923_v26  ;;  %1930 = vst [vmem:[%s3412_s23] sm:$0xff] %v1926_v5 }
 0x1cd   : > { %1931 = vst [vmem:[%s3412_s23 + $0x8] sm:$0xff] %v1927_v54 }
 0x1ee   : > { %v1842_v6 = vpop.f32.mrf.mxu0 }
 0x1ef   : > { %v1893_v51 = vpop.f32.mrf.mxu1  ;;  %v1843_v8 = vadd.f32 %v1842_v6, %v1792_v19 }
 0x1f0   : > { %v1844_v7 = vpop.f32.mrf.mxu0 }
 0x1f1   : > { %v1895_v59 = vpop.f32.mrf.mxu1  ;;  %v1894_v12 = vadd.f32 %v1893_v51, %v1843_v8  ;;  %v1845_v18 = vadd.f32 %v1844_v7, %v3407_v27 }
 0x1f2   : > { %v1846_v57 = vpop.f32.mrf.mxu0 }
 0x1f3   : > { %v1897_v2 = vpop.f32.mrf.mxu1  ;;  %v1847_v50 = vadd.f32 %v1846_v57, %v1796_v34  ;;  %2710 = vtanh.f32 %v1894_v12  ;;  %v1896_v29 = vadd.f32 %v1895_v59, %v1845_v18 }
 0x1f4   : > { %v1848_v62 = vpop.f32.mrf.mxu0 }
 0x1f5   : > { %v1899_v10 = vpop.f32.mrf.mxu1  ;;  %v1849_v63 = vadd.f32 %v1848_v62, %v1798_v40  ;;  %v1898_v13 = vadd.f32 %v1897_v2, %v1847_v50 }
 0x1f6   : > { %v1852_v15 = vpop.f32.mrf.mxu0 }
 0x1f7   : > { %v1903_v16 = vpop.f32.mrf.mxu1  ;;  %v1853_v20 = vadd.f32 %v1852_v15, %v1802_v11  ;;  %v1900_v21 = vadd.f32 %v1899_v10, %v1849_v63  ;;  %2712 = vtanh.f32 %v1898_v13 }
 0x1f8   : > { %v1854_v22 = vpop.f32.mrf.mxu0 }
 0x1f9   : > { %v1905_v19 = vpop.f32.mrf.mxu1  ;;  %v1904_v23 = vadd.f32 %v1903_v16, %v1853_v20  ;;  %v1855_v24 = vadd.f32 %v1854_v22, %v1804_v17 }
 0x1fa   : > { %v1856_v28 = vpop.f32.mrf.mxu0 }
 0x1fb   : > { %v1907_v9 = vpop.f32.mrf.mxu1  ;;  %2714 = vtanh.f32 %v1904_v23  ;;  %v1906_v30 = vadd.f32 %v1905_v19, %v1855_v24 }
 0x1fc   : > { %2716 = vtanh.f32 %v1900_v21  ;;  %v1857_v31 = vpop.f32.mrf.mxu0 }
 0x1fd   : > { %v1908_v14 = vpop.f32.mrf.mxu1  ;;  %2718 = vtanh.f32 %v1906_v30 }
 0x1fe   : > { %2720 = vtanh.f32 %v1896_v29 }
 0x200   : > { %v2711_v27 = vpop.eup %2710 }
 0x204   : > { %v2713_v32 = vpop.eup %2712 }
 0x208   : > { %v2715_v33 = vpop.eup %2714 }
 0x209   : > { %v2717_v34 = vpop.eup %2716  ;;  %v1924_v35 = vsub.f32 %v2713_v32, %v2715_v33 }
 0x20a   : > { %v2719_v36 = vpop.eup %2718 }
 0x20b   : > { %v1928_v37 = vadd.f32 %v2711_v27, %v1924_v35  ;;  %v1925_v38 = vsub.f32 %v2717_v34, %v2719_v36  ;;  %v2721_v39 = vpop.eup %2720 }
 0x20d   : > { %v1929_v40 = vadd.f32 %v2721_v39, %v1925_v38  ;;  %1932 = vst [vmem:[%s3412_s23 + $0x10] sm:$0xff] %v1928_v37 }
 0x20f   : > { %1933 = vst [vmem:[%s3412_s23 + $0x18] sm:$0xff] %v1929_v40 }
 0x210   : > { %2869 = shalt.err (!%p2866_p2)
}
 0x211   : > { %s2870_s27 = scalar_lea.hbm %s1949_s13, 512  ;;  %s2874_s6 = scalar_lea.hbm %s3467_s5, 1024 }
 0x212   : > { %p2871_p6 = scmp.ne.s32.totalorder %s1949_s13, %s2870_s27  ;;  %p2875_p9 = scmp.lt.s32.totalorder %s1949_s13, %s3467_s5 }
 0x213   : > { %p2876_p1 = scmp.lt.s32.totalorder %s2874_s6, %s2870_s27 }
 0x214   : > { %p2872_p5 = pnand %p2871_p6, %p3492_p13 }
 0x215   : > { %p2877_p0 = por %p2876_p1, %p2875_p9 }
 0x216   : > { %p2873_p11 = pneg %p2872_p5 }
 0x218   : > { %p2878_p7 = pnand %p2877_p0, %p2873_p11 }
 0x21a   : > { %2881 = shalt.err (!%p2878_p7)
}
 0x21b   : > { %2325 = dma.vmem_to_hbm [thread:$0]  (%p3492_p13), %s1952_s12, 512, %s1949_s13, %s1935_s1  }
 0x21c PF: > { %s3493_s24 = sld [smem:[#allocation17_spill]]  ;;  %s1963_s3 = sand.u32 1, %s2924_s18  }
 0x21d   : > { %s3494_s28 = sld [smem:[#allocation16_spill]]  ;;  %s1964_s23 = scalar_lea.sflag [#allocation4], %s1963_s3 }
 0x222   : > { %p3495_p4 = scmp.ne.s32.totalorder %s3493_s24, 0 }
 0x223   : > { %p3496_p3 = scmp.ge.s32.totalorder %s3494_s28, 2 }
 0x225   : > { %p2345_p10 = pnand %p3496_p3, %p3495_p4 }
 0x227   : > { %p2346_p8 = pneg %p2345_p10 }
 0x229   : > { %2919 = dma.done.wait (%p2346_p8), %s1964_s23, 512  }
 0x22a   : > { %2921 = vsyncadd (%p2346_p8), %s1964_s23, 4294966784  ;;  %s23_s23 = sadd.s32 1, %s3494_s28   ;;  %s3497_s18 = smov %s2928_s19 }
 0x22b   : > { %p20_p12 = scmp.ge.s32.totalorder %s23_s23, 4   ;;  %s3498_s19 = smov %s2932_s20 }
 0x22c   : > { %s3499_s20 = smov %s3093_s15  ;;  %s3500_s21 = smov %s2940_s22 }
 0x22d   : > { %s3501_s22 = smov %s3503_s11  ;;  %22 = sbr.rel (!%p20_p12) target bundleno = 11 (0xb), region = 112 }
 0x232   :  { %1969 = vsyncpa [#allocation3], 1 }
 0x233   :  { %1971 = vsyncpa [#allocation3 + $0x1], 1 }
 0x234   :  { %1972 = vsyncpa [#allocation6], 1 }
 0x235   :  { %1973 = vsyncpa [#allocation9], 1 }
 0x236   :  { %1975 = vsyncpa [#allocation9 + $0x1], 1 }
 0x237   :  { %1976 = vsyncpa [#allocation4], 1 }
 0x238   :  { %1978 = vsyncpa [#allocation4 + $0x1], 1 }

</bundles_post_ra>
